<compile_context>
chip_gen: v6e
topology: v6e:2x2x1
jax: 0.10.0
libtpu: 0.0.40
codegen_flags: <defaults>
</compile_context>

<pallas_src>
import functools

import jax
import jax.numpy as jnp
from jax.experimental import pallas as pl
from jax.experimental.pallas import tpu as pltpu


def _round_up(x, m):
    return (x + m - 1) // m * m


def _physical_vmem_bytes():
    try:
        return int(pltpu.get_tpu_info().vmem_capacity_bytes)
    except Exception:
        return 64 << 20   # conservative fallback: v7x per-TC VMEM


# ---------------------------------------------------------------------------
# Kernels
# ---------------------------------------------------------------------------
def _qkv_folded_kernel(x_ref, wq_ref, wk_ref, wv_ref,
                       bq_ref, bk_ref, bv_ref, o_ref, *, dim):
    """LoRA already folded into wq/wv: three (tm,C)@(C,C) MXU passes + bias."""
    x = x_ref[...]

    q = jnp.dot(x, wq_ref[...], preferred_element_type=jnp.float32) + bq_ref[...]
    o_ref[:, :dim] = q.astype(o_ref.dtype)

    k = jnp.dot(x, wk_ref[...], preferred_element_type=jnp.float32) + bk_ref[...]
    o_ref[:, dim:2 * dim] = k.astype(o_ref.dtype)

    v = jnp.dot(x, wv_ref[...], preferred_element_type=jnp.float32) + bv_ref[...]
    o_ref[:, 2 * dim:] = v.astype(o_ref.dtype)


def _qkv_dynamic_lora_kernel(x_ref, wq_ref, wk_ref, wv_ref,
                             bq_ref, bk_ref, bv_ref,
                             a_qv_ref, b_qv_ref, o_ref, *, dim):
    """Dynamic adapters: merged LoRA-A (C,2r) + block-diagonal LoRA-B (2r,2C)."""
    x = x_ref[...]

    # Shared first stage: (tm, C) @ (C, 2r) -> (tm, 2r).
    low = jnp.dot(x, a_qv_ref[...], preferred_element_type=jnp.float32)
    # Single padded second stage against a block-diagonal RHS -> (tm, 2C):
    #   [:, :C] = scale * x @ A_q.T @ B_q.T ; [:, C:] = scale * x @ A_v.T @ B_v.T
    lora = jnp.dot(low.astype(b_qv_ref.dtype), b_qv_ref[...],
                   preferred_element_type=jnp.float32)

    q = jnp.dot(x, wq_ref[...], preferred_element_type=jnp.float32) + bq_ref[...]
    q += lora[:, :dim]
    o_ref[:, :dim] = q.astype(o_ref.dtype)

    k = jnp.dot(x, wk_ref[...], preferred_element_type=jnp.float32) + bk_ref[...]
    o_ref[:, dim:2 * dim] = k.astype(o_ref.dtype)

    v = jnp.dot(x, wv_ref[...], preferred_element_type=jnp.float32) + bv_ref[...]
    v += lora[:, dim:]
    o_ref[:, 2 * dim:] = v.astype(o_ref.dtype)


# ---------------------------------------------------------------------------
# One-time weight preparation (hoisted out of the per-call path)
# ---------------------------------------------------------------------------
def prepare_lora_qkv_params(w_qkv, b_qkv, w_a_q, w_b_q, w_a_v, w_b_v, *,
                            r, alpha, compute_dtype=jnp.bfloat16,
                            fold_lora=True):
    """Weights in PyTorch (out_features, in_features) layout.

    Returns a dict of device arrays ready for lora_qkv_apply().
    """
    C = w_qkv.shape[1]
    scale = float(alpha // r)          # integer division, as in PyTorch
    cdt = jnp.dtype(compute_dtype)
    f32 = jnp.float32

    wqkv_t = w_qkv.astype(f32).T                     # (C, 3C), (in, out)
    wq_t = wqkv_t[:, :C]
    wk_t = wqkv_t[:, C:2 * C]
    wv_t = wqkv_t[:, 2 * C:]
    if fold_lora:
        # Frozen adapters: fold scale*(B@A) into the q/v column blocks (f32),
        # then cast once. Kernel sees no LoRA matmuls at all.
        wq_t = wq_t + scale * (w_a_q.astype(f32).T @ w_b_q.astype(f32).T)
        wv_t = wv_t + scale * (w_a_v.astype(f32).T @ w_b_v.astype(f32).T)

    params = dict(
        dim=int(C), rank=int(r), fold_lora=bool(fold_lora), compute_dtype=cdt,
        wq=wq_t.astype(cdt), wk=wk_t.astype(cdt), wv=wv_t.astype(cdt),
        bq=b_qkv[:C].reshape(1, C).astype(f32),
        bk=b_qkv[C:2 * C].reshape(1, C).astype(f32),
        bv=b_qkv[2 * C:].reshape(1, C).astype(f32),
    )
    if not fold_lora:
        # Merge the two LoRA-A projections into a single (C, 2r) RHS, and the
        # two (pre-scaled) LoRA-B projections into one block-diagonal (2r, 2C).
        a_qv = jnp.concatenate([w_a_q.astype(f32).T, w_a_v.astype(f32).T], axis=1)
        b_qv = jnp.zeros((2 * r, 2 * C), f32)
        b_qv = b_qv.at[:r, :C].set(scale * w_b_q.astype(f32).T)
        b_qv = b_qv.at[r:, C:].set(scale * w_b_v.astype(f32).T)
        params["a_qv"] = a_qv.astype(cdt)
        params["b_qv"] = b_qv.astype(cdt)
    return params


# ---------------------------------------------------------------------------
# Per-call apply
# ---------------------------------------------------------------------------
def lora_qkv_apply(params, x, *, tm=1024):
    B, N, C = x.shape
    assert C == params["dim"]
    M = B * N
    cdt = params["compute_dtype"]
    r = params["rank"]
    fold = params["fold_lora"]

    in_isz = jnp.dtype(cdt).itemsize
    out_isz = jnp.dtype(x.dtype).itemsize
    min_rows = 8 * max(1, 4 // in_isz)          # f32 -> 8, bf16 -> 16

    tile_m = tm if M >= tm else _round_up(M, min_rows)
    tile_m = max(min_rows, _round_up(tile_m, min_rows))

    def est_vmem(t, const_bufs):
        e = 2 * t * C * in_isz                   # double-buffered x tiles
        e += 2 * t * 3 * C * out_isz             # double-buffered out tiles
        e += const_bufs * 3 * C * C * in_isz     # resident qkv column weights
        e += const_bufs * 3 * C * 4              # f32 biases
        e += t * C * 4                           # one live f32 column intermediate
        if not fold:
            e += const_bufs * (C * 2 * r + 2 * r * 2 * C) * in_isz
            e += t * 2 * C * 4                   # f32 LoRA intermediate
        return e

    budget = int(_physical_vmem_bytes() * 0.8)   # stay below physical VMEM
    while tile_m > 256 and est_vmem(tile_m, 1) > budget:
        tile_m //= 2
    Mp = _round_up(M, tile_m)

    x_flat = x.reshape(M, C).astype(cdt)
    if Mp != M:
        x_flat = jnp.pad(x_flat, ((0, Mp - M), (0, 0)))

    if fold:
        kernel = functools.partial(_qkv_folded_kernel, dim=C)
        consts = [params["wq"], params["wk"], params["wv"],
                  params["bq"], params["bk"], params["bv"]]
    else:
        kernel = functools.partial(_qkv_dynamic_lora_kernel, dim=C)
        consts = [params["wq"], params["wk"], params["wv"],
                  params["bq"], params["bk"], params["bv"],
                  params["a_qv"], params["b_qv"]]

    def run(single_buffer_consts):
        nbuf = 1 if single_buffer_consts else 2
        if single_buffer_consts:
            # Constants never change across the grid -> single-buffer them.
            const_spec = lambda s: pl.BlockSpec(s, lambda i: (0, 0),
                                                pipeline_mode=pl.Buffered(1))
        else:
            const_spec = lambda s: pl.BlockSpec(s, lambda i: (0, 0))
        vmem_limit = int(min(budget,
                             max(int(est_vmem(tile_m, nbuf) * 1.5), 16 << 20)))
        return pl.pallas_call(
            kernel,
            out_shape=jax.ShapeDtypeStruct((Mp, 3 * C), x.dtype),
            grid_spec=pltpu.PrefetchScalarGridSpec(
                num_scalar_prefetch=0,
                grid=(Mp // tile_m,),
                in_specs=[pl.BlockSpec((tile_m, C), lambda i: (i, 0))]  # x (pipelined)
                         + [const_spec(c.shape) for c in consts],
                out_specs=pl.BlockSpec((tile_m, 3 * C), lambda i: (i, 0)),
            ),
            compiler_params=pltpu.CompilerParams(
                dimension_semantics=("parallel",),
                vmem_limit_bytes=vmem_limit),
        )(x_flat, *consts)

    try:
        out_flat = run(True)
    except Exception:
        # pipeline_mode=pl.Buffered(1) not supported on this build -> fall back
        # to default double-buffering of the resident constants.
        out_flat = run(False)

    return out_flat[:M].reshape(B, N, 3 * C)


def lora_qkv_forward(x, w_qkv, b_qkv, w_a_q, w_b_q, w_a_v, w_b_v, *,
                     r, alpha, tm=1024, compute_dtype=jnp.bfloat16,
                     fold_lora=True):
    """Convenience wrapper (prep + apply). Prefer prepare_* once at load time."""
    params = prepare_lora_qkv_params(w_qkv, b_qkv, w_a_q, w_b_q, w_a_v, w_b_v,
                                     r=r, alpha=alpha,
                                     compute_dtype=compute_dtype,
                                     fold_lora=fold_lora)
    return lora_qkv_apply(params, x, tm=tm)


def _reference(x, w_qkv, b_qkv, w_a_q, w_b_q, w_a_v, w_b_v, *, r, alpha):
    """Pure-JAX reference mirroring the PyTorch forward."""
    scale = alpha // r
    qkv = jnp.einsum("bnc,oc->bno", x, w_qkv) + b_qkv
    new_q = jnp.einsum("bnr,or->bno", jnp.einsum("bnc,rc->bnr", x, w_a_q), w_b_q)
    new_v = jnp.einsum("bnr,or->bno", jnp.einsum("bnc,rc->bnr", x, w_a_v), w_b_v)
    C = x.shape[-1]
    qkv = qkv.at[:, :, :C].add(scale * new_q)
    qkv = qkv.at[:, :, -C:].add(scale * new_v)
    return qkv


if __name__ == "__main__":
    B, N, C = 2, 8, 32   # batch, seq, dim
    r, alpha = 4, 8      # LoRA rank / scaling

    key = jax.random.PRNGKey(0)
    kx, kw, kb, ka1, kb1, ka2, kb2 = jax.random.split(key, 7)

    x = jax.random.normal(kx, (B, N, C), dtype=jnp.float32)
    # nn.Linear(dim, dim*3, bias=True): weight (3C, C), bias (3C,)
    w_qkv = jax.random.normal(kw, (3 * C, C), dtype=jnp.float32) * 0.05
    b_qkv = jax.random.normal(kb, (3 * C,), dtype=jnp.float32) * 0.05
    # LoRA A: (r, C), LoRA B: (C, r)  (no bias, per standard LoRA linears)
    w_a_q = jax.random.normal(ka1, (r, C), dtype=jnp.float32) * 0.05
    w_b_q = jax.random.normal(kb1, (C, r), dtype=jnp.float32) * 0.05
    w_a_v = jax.random.normal(ka2, (r, C), dtype=jnp.float32) * 0.05
    w_b_v = jax.random.normal(kb2, (C, r), dtype=jnp.float32) * 0.05

    ref = _reference(x, w_qkv, b_qkv, w_a_q, w_b_q, w_a_v, w_b_v, r=r, alpha=alpha)

    # 1) Production path: bf16 operands, LoRA folded into the weights (fastest).
    params_folded = prepare_lora_qkv_params(
        w_qkv, b_qkv, w_a_q, w_b_q, w_a_v, w_b_v, r=r, alpha=alpha)
    out_bf16 = jax.block_until_ready(lora_qkv_apply(params_folded, x))
    assert out_bf16.shape == (B, N, 3 * C)
    assert jnp.allclose(out_bf16, ref, atol=5e-2, rtol=5e-2)

    # 2) Dynamic-adapter path in f32 (exercises the in-kernel LoRA matmuls).
    params_dyn = prepare_lora_qkv_params(
        w_qkv, b_qkv, w_a_q, w_b_q, w_a_v, w_b_v, r=r, alpha=alpha,
        compute_dtype=jnp.float32, fold_lora=False)
    out_f32 = jax.block_until_ready(lora_qkv_apply(params_dyn, x))
    assert out_f32.shape == (B, N, 3 * C)
    assert jnp.allclose(out_f32, ref, atol=1e-4, rtol=1e-4)

    print("KERNEL_OK")
</pallas_src>

<mosaic_0001>
module attributes {stable_mosaic.version = 11 : i64} {
  func.func @_qkv_folded_kernel(%arg0: i32, %arg1: memref<16x32xbf16, #tpu.memory_space<vmem>>, %arg2: memref<32x32xbf16, #tpu.memory_space<vmem>>, %arg3: memref<32x32xbf16, #tpu.memory_space<vmem>>, %arg4: memref<32x32xbf16, #tpu.memory_space<vmem>>, %arg5: memref<1x32xf32, #tpu.memory_space<vmem>>, %arg6: memref<1x32xf32, #tpu.memory_space<vmem>>, %arg7: memref<1x32xf32, #tpu.memory_space<vmem>>, %arg8: memref<16x96xf32, #tpu.memory_space<vmem>>) attributes {dimension_semantics = [#tpu.dimension_semantics<parallel>], iteration_bounds = array<i64: 1>, scalar_prefetch = 0 : i64, scratch_operands = 0 : i64, tpu.core_type = #tpu.core_type<tc>, window_params = [{transform_indices = @transform_0, window_bounds = array<i64: 16, 32>}, {pipeline_mode = #tpu.pipeline_mode<synchronous>, transform_indices = @transform_1, window_bounds = array<i64: 32, 32>}, {pipeline_mode = #tpu.pipeline_mode<synchronous>, transform_indices = @transform_2, window_bounds = array<i64: 32, 32>}, {pipeline_mode = #tpu.pipeline_mode<synchronous>, transform_indices = @transform_3, window_bounds = array<i64: 32, 32>}, {pipeline_mode = #tpu.pipeline_mode<synchronous>, transform_indices = @transform_4, window_bounds = array<i64: 1, 32>}, {pipeline_mode = #tpu.pipeline_mode<synchronous>, transform_indices = @transform_5, window_bounds = array<i64: 1, 32>}, {pipeline_mode = #tpu.pipeline_mode<synchronous>, transform_indices = @transform_6, window_bounds = array<i64: 1, 32>}, {transform_indices = @transform_7, window_bounds = array<i64: 16, 96>}]} {
    %c0 = arith.constant 0 : index
    %c0_0 = arith.constant 0 : index
    %0 = vector.load %arg1[%c0, %c0_0] : memref<16x32xbf16, #tpu.memory_space<vmem>>, vector<16x32xbf16>
    %c0_1 = arith.constant 0 : index
    %c0_2 = arith.constant 0 : index
    %1 = vector.load %arg2[%c0_1, %c0_2] : memref<32x32xbf16, #tpu.memory_space<vmem>>, vector<32x32xbf16>
    %cst = arith.constant dense<0.000000e+00> : vector<16x32xf32>
    %2 = tpu.matmul %0, %1, %cst {dimension_numbers = #tpu.dot_dimension_numbers<[1], [0], [0], [1], [0, 0, 1, 1], [], []>} : vector<16x32xbf16>, vector<32x32xbf16>, vector<16x32xf32> -> vector<16x32xf32>
    %c0_3 = arith.constant 0 : index
    %c0_4 = arith.constant 0 : index
    %3 = vector.load %arg5[%c0_3, %c0_4] : memref<1x32xf32, #tpu.memory_space<vmem>>, vector<1x32xf32>
    %4 = vector.broadcast %3 : vector<1x32xf32> to vector<16x32xf32>
    %5 = arith.addf %2, %4 : vector<16x32xf32>
    %c0_5 = arith.constant 0 : index
    %c0_6 = arith.constant 0 : index
    %6 = vector.load %arg8[%c0_5, %c0_6] : memref<16x96xf32, #tpu.memory_space<vmem>>, vector<16x32xf32>
    tpu.vector_store %arg8[%c0_5, %c0_6], %5 {strides = array<i32>} : memref<16x96xf32, #tpu.memory_space<vmem>>, vector<16x32xf32>,
    %c0_7 = arith.constant 0 : index
    %c0_8 = arith.constant 0 : index
    %7 = vector.load %arg3[%c0_7, %c0_8] : memref<32x32xbf16, #tpu.memory_space<vmem>>, vector<32x32xbf16>
    %cst_9 = arith.constant dense<0.000000e+00> : vector<16x32xf32>
    %8 = tpu.matmul %0, %7, %cst_9 {dimension_numbers = #tpu.dot_dimension_numbers<[1], [0], [0], [1], [0, 0, 1, 1], [], []>} : vector<16x32xbf16>, vector<32x32xbf16>, vector<16x32xf32> -> vector<16x32xf32>
    %c0_10 = arith.constant 0 : index
    %c0_11 = arith.constant 0 : index
    %9 = vector.load %arg6[%c0_10, %c0_11] : memref<1x32xf32, #tpu.memory_space<vmem>>, vector<1x32xf32>
    %10 = vector.broadcast %9 : vector<1x32xf32> to vector<16x32xf32>
    %11 = arith.addf %8, %10 : vector<16x32xf32>
    %c0_12 = arith.constant 0 : index
    %c32 = arith.constant 32 : index
    %12 = vector.load %arg8[%c0_12, %c32] : memref<16x96xf32, #tpu.memory_space<vmem>>, vector<16x32xf32>
    tpu.vector_store %arg8[%c0_12, %c32], %11 {strides = array<i32>} : memref<16x96xf32, #tpu.memory_space<vmem>>, vector<16x32xf32>,
    %c0_13 = arith.constant 0 : index
    %c0_14 = arith.constant 0 : index
    %13 = vector.load %arg4[%c0_13, %c0_14] : memref<32x32xbf16, #tpu.memory_space<vmem>>, vector<32x32xbf16>
    %cst_15 = arith.constant dense<0.000000e+00> : vector<16x32xf32>
    %14 = tpu.matmul %0, %13, %cst_15 {dimension_numbers = #tpu.dot_dimension_numbers<[1], [0], [0], [1], [0, 0, 1, 1], [], []>} : vector<16x32xbf16>, vector<32x32xbf16>, vector<16x32xf32> -> vector<16x32xf32>
    %c0_16 = arith.constant 0 : index
    %c0_17 = arith.constant 0 : index
    %15 = vector.load %arg7[%c0_16, %c0_17] : memref<1x32xf32, #tpu.memory_space<vmem>>, vector<1x32xf32>
    %16 = vector.broadcast %15 : vector<1x32xf32> to vector<16x32xf32>
    %17 = arith.addf %14, %16 : vector<16x32xf32>
    %c0_18 = arith.constant 0 : index
    %c64 = arith.constant 64 : index
    %18 = vector.load %arg8[%c0_18, %c64] : memref<16x96xf32, #tpu.memory_space<vmem>>, vector<16x32xf32>
    tpu.vector_store %arg8[%c0_18, %c64], %17 {strides = array<i32>} : memref<16x96xf32, #tpu.memory_space<vmem>>, vector<16x32xf32>,
    return
  }
  func.func @transform_0(%arg0: i32) -> (i32, i32) {
    %c0_i32 = arith.constant 0 : i32
    %c0_i32_0 = arith.constant 0 : i32
    return %arg0, %c0_i32 : i32, i32
  }
  func.func @transform_1(%arg0: i32) -> (i32, i32) {
    %c0_i32 = arith.constant 0 : i32
    %c0_i32_0 = arith.constant 0 : i32
    %c0_i32_1 = arith.constant 0 : i32
    return %c0_i32, %c0_i32_0 : i32, i32
  }
  func.func @transform_2(%arg0: i32) -> (i32, i32) {
    %c0_i32 = arith.constant 0 : i32
    %c0_i32_0 = arith.constant 0 : i32
    %c0_i32_1 = arith.constant 0 : i32
    return %c0_i32, %c0_i32_0 : i32, i32
  }
  func.func @transform_3(%arg0: i32) -> (i32, i32) {
    %c0_i32 = arith.constant 0 : i32
    %c0_i32_0 = arith.constant 0 : i32
    %c0_i32_1 = arith.constant 0 : i32
    return %c0_i32, %c0_i32_0 : i32, i32
  }
  func.func @transform_4(%arg0: i32) -> (i32, i32) {
    %c0_i32 = arith.constant 0 : i32
    %c0_i32_0 = arith.constant 0 : i32
    %c0_i32_1 = arith.constant 0 : i32
    return %c0_i32, %c0_i32_0 : i32, i32
  }
  func.func @transform_5(%arg0: i32) -> (i32, i32) {
    %c0_i32 = arith.constant 0 : i32
    %c0_i32_0 = arith.constant 0 : i32
    %c0_i32_1 = arith.constant 0 : i32
    return %c0_i32, %c0_i32_0 : i32, i32
  }
  func.func @transform_6(%arg0: i32) -> (i32, i32) {
    %c0_i32 = arith.constant 0 : i32
    %c0_i32_0 = arith.constant 0 : i32
    %c0_i32_1 = arith.constant 0 : i32
    return %c0_i32, %c0_i32_0 : i32, i32
  }
  func.func @transform_7(%arg0: i32) -> (i32, i32) {
    %c0_i32 = arith.constant 0 : i32
    %c0_i32_0 = arith.constant 0 : i32
    return %arg0, %c0_i32 : i32, i32
  }
}

module attributes {stable_mosaic.version = 11 : i64} {
  func.func @_qkv_folded_kernel(%arg0: i32, %arg1: memref<16x32xbf16, #tpu.memory_space<vmem>>, %arg2: memref<32x32xbf16, #tpu.memory_space<vmem>>, %arg3: memref<32x32xbf16, #tpu.memory_space<vmem>>, %arg4: memref<32x32xbf16, #tpu.memory_space<vmem>>, %arg5: memref<1x32xf32, #tpu.memory_space<vmem>>, %arg6: memref<1x32xf32, #tpu.memory_space<vmem>>, %arg7: memref<1x32xf32, #tpu.memory_space<vmem>>, %arg8: memref<16x96xf32, #tpu.memory_space<vmem>>) attributes {dimension_semantics = [#tpu.dimension_semantics<parallel>], iteration_bounds = array<i64: 1>, scalar_prefetch = 0 : i64, scratch_operands = 0 : i64, tpu.core_type = #tpu.core_type<tc>, window_params = [{transform_indices = @transform_0, window_bounds = array<i64: 16, 32>}, {pipeline_mode = #tpu.pipeline_mode<synchronous>, transform_indices = @transform_1, window_bounds = array<i64: 32, 32>}, {pipeline_mode = #tpu.pipeline_mode<synchronous>, transform_indices = @transform_2, window_bounds = array<i64: 32, 32>}, {pipeline_mode = #tpu.pipeline_mode<synchronous>, transform_indices = @transform_3, window_bounds = array<i64: 32, 32>}, {pipeline_mode = #tpu.pipeline_mode<synchronous>, transform_indices = @transform_4, window_bounds = array<i64: 1, 32>}, {pipeline_mode = #tpu.pipeline_mode<synchronous>, transform_indices = @transform_5, window_bounds = array<i64: 1, 32>}, {pipeline_mode = #tpu.pipeline_mode<synchronous>, transform_indices = @transform_6, window_bounds = array<i64: 1, 32>}, {transform_indices = @transform_7, window_bounds = array<i64: 16, 96>}]} {
    %c0 = arith.constant 0 : index
    %c0_0 = arith.constant 0 : index
    %0 = vector.load %arg1[%c0, %c0_0] : memref<16x32xbf16, #tpu.memory_space<vmem>>, vector<16x32xbf16>
    %c0_1 = arith.constant 0 : index
    %c0_2 = arith.constant 0 : index
    %1 = vector.load %arg2[%c0_1, %c0_2] : memref<32x32xbf16, #tpu.memory_space<vmem>>, vector<32x32xbf16>
    %cst = arith.constant dense<0.000000e+00> : vector<16x32xf32>
    %2 = tpu.matmul %0, %1, %cst {dimension_numbers = #tpu.dot_dimension_numbers<[1], [0], [0], [1], [0, 0, 1, 1], [], []>} : vector<16x32xbf16>, vector<32x32xbf16>, vector<16x32xf32> -> vector<16x32xf32>
    %c0_3 = arith.constant 0 : index
    %c0_4 = arith.constant 0 : index
    %3 = vector.load %arg5[%c0_3, %c0_4] : memref<1x32xf32, #tpu.memory_space<vmem>>, vector<1x32xf32>
    %4 = vector.broadcast %3 : vector<1x32xf32> to vector<16x32xf32>
    %5 = arith.addf %2, %4 : vector<16x32xf32>
    %c0_5 = arith.constant 0 : index
    %c0_6 = arith.constant 0 : index
    %6 = vector.load %arg8[%c0_5, %c0_6] : memref<16x96xf32, #tpu.memory_space<vmem>>, vector<16x32xf32>
    tpu.vector_store %arg8[%c0_5, %c0_6], %5 {strides = array<i32>} : memref<16x96xf32, #tpu.memory_space<vmem>>, vector<16x32xf32>,
    %c0_7 = arith.constant 0 : index
    %c0_8 = arith.constant 0 : index
    %7 = vector.load %arg3[%c0_7, %c0_8] : memref<32x32xbf16, #tpu.memory_space<vmem>>, vector<32x32xbf16>
    %cst_9 = arith.constant dense<0.000000e+00> : vector<16x32xf32>
    %8 = tpu.matmul %0, %7, %cst_9 {dimension_numbers = #tpu.dot_dimension_numbers<[1], [0], [0], [1], [0, 0, 1, 1], [], []>} : vector<16x32xbf16>, vector<32x32xbf16>, vector<16x32xf32> -> vector<16x32xf32>
    %c0_10 = arith.constant 0 : index
    %c0_11 = arith.constant 0 : index
    %9 = vector.load %arg6[%c0_10, %c0_11] : memref<1x32xf32, #tpu.memory_space<vmem>>, vector<1x32xf32>
    %10 = vector.broadcast %9 : vector<1x32xf32> to vector<16x32xf32>
    %11 = arith.addf %8, %10 : vector<16x32xf32>
    %c0_12 = arith.constant 0 : index
    %c32 = arith.constant 32 : index
    %12 = vector.load %arg8[%c0_12, %c32] : memref<16x96xf32, #tpu.memory_space<vmem>>, vector<16x32xf32>
    tpu.vector_store %arg8[%c0_12, %c32], %11 {strides = array<i32>} : memref<16x96xf32, #tpu.memory_space<vmem>>, vector<16x32xf32>,
    %c0_13 = arith.constant 0 : index
    %c0_14 = arith.constant 0 : index
    %13 = vector.load %arg4[%c0_13, %c0_14] : memref<32x32xbf16, #tpu.memory_space<vmem>>, vector<32x32xbf16>
    %cst_15 = arith.constant dense<0.000000e+00> : vector<16x32xf32>
    %14 = tpu.matmul %0, %13, %cst_15 {dimension_numbers = #tpu.dot_dimension_numbers<[1], [0], [0], [1], [0, 0, 1, 1], [], []>} : vector<16x32xbf16>, vector<32x32xbf16>, vector<16x32xf32> -> vector<16x32xf32>
    %c0_16 = arith.constant 0 : index
    %c0_17 = arith.constant 0 : index
    %15 = vector.load %arg7[%c0_16, %c0_17] : memref<1x32xf32, #tpu.memory_space<vmem>>, vector<1x32xf32>
    %16 = vector.broadcast %15 : vector<1x32xf32> to vector<16x32xf32>
    %17 = arith.addf %14, %16 : vector<16x32xf32>
    %c0_18 = arith.constant 0 : index
    %c64 = arith.constant 64 : index
    %18 = vector.load %arg8[%c0_18, %c64] : memref<16x96xf32, #tpu.memory_space<vmem>>, vector<16x32xf32>
    tpu.vector_store %arg8[%c0_18, %c64], %17 {strides = array<i32>} : memref<16x96xf32, #tpu.memory_space<vmem>>, vector<16x32xf32>,
    return
  }
  func.func @transform_0(%arg0: i32) -> (i32, i32) {
    %c0_i32 = arith.constant 0 : i32
    %c0_i32_0 = arith.constant 0 : i32
    return %arg0, %c0_i32 : i32, i32
  }
  func.func @transform_1(%arg0: i32) -> (i32, i32) {
    %c0_i32 = arith.constant 0 : i32
    %c0_i32_0 = arith.constant 0 : i32
    %c0_i32_1 = arith.constant 0 : i32
    return %c0_i32, %c0_i32_0 : i32, i32
  }
  func.func @transform_2(%arg0: i32) -> (i32, i32) {
    %c0_i32 = arith.constant 0 : i32
    %c0_i32_0 = arith.constant 0 : i32
    %c0_i32_1 = arith.constant 0 : i32
    return %c0_i32, %c0_i32_0 : i32, i32
  }
  func.func @transform_3(%arg0: i32) -> (i32, i32) {
    %c0_i32 = arith.constant 0 : i32
    %c0_i32_0 = arith.constant 0 : i32
    %c0_i32_1 = arith.constant 0 : i32
    return %c0_i32, %c0_i32_0 : i32, i32
  }
  func.func @transform_4(%arg0: i32) -> (i32, i32) {
    %c0_i32 = arith.constant 0 : i32
    %c0_i32_0 = arith.constant 0 : i32
    %c0_i32_1 = arith.constant 0 : i32
    return %c0_i32, %c0_i32_0 : i32, i32
  }
  func.func @transform_5(%arg0: i32) -> (i32, i32) {
    %c0_i32 = arith.constant 0 : i32
    %c0_i32_0 = arith.constant 0 : i32
    %c0_i32_1 = arith.constant 0 : i32
    return %c0_i32, %c0_i32_0 : i32, i32
  }
  func.func @transform_6(%arg0: i32) -> (i32, i32) {
    %c0_i32 = arith.constant 0 : i32
    %c0_i32_0 = arith.constant 0 : i32
    %c0_i32_1 = arith.constant 0 : i32
    return %c0_i32, %c0_i32_0 : i32, i32
  }
  func.func @transform_7(%arg0: i32) -> (i32, i32) {
    %c0_i32 = arith.constant 0 : i32
    %c0_i32_0 = arith.constant 0 : i32
    return %arg0, %c0_i32 : i32, i32
  }
}

</mosaic_0001>

<bundles_post_ra>
// kernel: tpu_custom_call.1
= control target key start
LH: loop header
LB: loop body
LE: loop exit
PB: predicated region body
PF: predicated region fallthrough
CT: control target
= control target key end

     0   :  { %12 = vsyncpa [#allocation3], 0  ;;  %s600_s0 = inlined_call_operand.hbm [shape: bf16[16,32], index: 0, kind: input, shape index: {}]   ;;  %s601_s1 = inlined_call_operand.hbm [shape: bf16[32,32], index: 1, kind: input, shape index: {}]   ;;  %s602_s2 = inlined_call_operand.hbm [shape: bf16[32,32], index: 2, kind: input, shape index: {}]   ;;  %s603_s3 = inlined_call_operand.hbm [shape: bf16[32,32], index: 3, kind: input, shape index: {}]   ;;  %s604_s4 = inlined_call_operand.vmem [shape: f32[1,32], index: 4, kind: input, shape index: {}]   ;;  %s605_s5 = inlined_call_operand.vmem [shape: f32[1,32], index: 5, kind: input, shape index: {}]   ;;  %s606_s6 = inlined_call_operand.vmem [shape: f32[1,32], index: 6, kind: input, shape index: {}]   ;;  %s607_s7 = inlined_call_operand.hbm [shape: f32[16,96], index: 7, kind: output, shape index: {}]  }
   0x1   :  { %13 = vsyncpa [#allocation6], 0 }
   0x2   :  { %14 = vsyncpa [#allocation9], 0 }
   0x3   :  { %15 = vsyncpa [#allocation4], 0  ;;  %s502_s24 = smov [#allocation5]   ;;  %s503_s26 = smov [#allocation2]  }
   0x4   :  { %s33_s25 = sshll.u32 %s502_s24, 4  ;;  %s21_s27 = sshll.u32 %s503_s26, 4  ;;  %s34_s25 = int_to_ptr.vmem [resolvable:$true] %s33_s25  ;;  %s22_s27 = int_to_ptr.vmem [resolvable:$true] %s21_s27 }
   0x5   :  { %s402_s28 = scalar_lea.vmem %s34_s25, 256  ;;  %p407_p1 = scmp.lt.s32.totalorder %s34_s25, %s34_s25 }
   0x6   :  { %p403_p0 = scmp.ne.s32.totalorder %s34_s25, %s402_s28  ;;  %p408_p2 = scmp.lt.s32.totalorder %s402_s28, %s402_s28 }
   0x8   :  { %p409_p3 = por %p408_p2, %p407_p1 }
   0xa   :  { %p410_p4 = pnand %p409_p3, %p403_p0 }
   0xc   :  { %413 = shalt.err (!%p410_p4)
}
   0xd   :  { %s504_s29 = smov 64   ;;  %s505_s30 = smov 4  }
   0xe   :  { %39 = dma.hbm_to_vmem [thread:$0]  %s601_s1, 256, %s34_s25, [#allocation6], %s504_s29, %s504_s29, %s505_s30  }
   0xf   :  { %s422_s10 = scalar_lea.vmem %s22_s27, 128  ;;  %p427_p6 = scmp.lt.s32.totalorder %s22_s27, %s22_s27 }
  0x10   :  { %p423_p5 = scmp.ne.s32.totalorder %s22_s27, %s422_s10  ;;  %p428_p7 = scmp.lt.s32.totalorder %s422_s10, %s422_s10 }
  0x12   :  { %p429_p8 = por %p428_p7, %p427_p6 }
  0x14   :  { %p430_p9 = pnand %p429_p8, %p423_p5 }
  0x16   :  { %433 = shalt.err (!%p430_p9)
}
  0x17   :  { %27 = dma.hbm_to_vmem [thread:$0]  %s600_s0, 128, %s22_s27, [#allocation3], %s504_s29, %s504_s29, %s505_s30  }
  0x18   :  { %s506_s13 = smov [#allocation7]   ;;  %s507_s15 = smov [#allocation8]  }
  0x19   :  { %s45_s14 = sshll.u32 %s506_s13, 4  ;;  %s57_s16 = sshll.u32 %s507_s15, 4  ;;  %s46_s14 = int_to_ptr.vmem [resolvable:$true] %s45_s14  ;;  %s58_s16 = int_to_ptr.vmem [resolvable:$true] %s57_s16 }
  0x1a   :  { %s442_s1 = scalar_lea.vmem %s46_s14, 256  ;;  %p447_p11 = scmp.lt.s32.totalorder %s46_s14, %s46_s14 }
  0x1b   :  { %p443_p10 = scmp.ne.s32.totalorder %s46_s14, %s442_s1  ;;  %p448_p12 = scmp.lt.s32.totalorder %s442_s1, %s442_s1 }
  0x1d   :  { %p449_p13 = por %p448_p12, %p447_p11 }
  0x1f   :  { %p450_p0 = pnand %p449_p13, %p443_p10 }
  0x21   :  { %453 = shalt.err (!%p450_p0)
}
  0x22   :  { %51 = dma.hbm_to_vmem [thread:$0]  %s602_s2, 256, %s46_s14, [#allocation6], %s504_s29, %s504_s29, %s505_s30  }
  0x23   :  { %s462_s0 = scalar_lea.vmem %s58_s16, 256  ;;  %p467_p2 = scmp.lt.s32.totalorder %s58_s16, %s58_s16 }
  0x24   :  { %p463_p1 = scmp.ne.s32.totalorder %s58_s16, %s462_s0  ;;  %p468_p3 = scmp.lt.s32.totalorder %s462_s0, %s462_s0 }
  0x26   :  { %p469_p4 = por %p468_p3, %p467_p2 }
  0x28   :  { %p470_p5 = pnand %p469_p4, %p463_p1 }
  0x2a   :  { %473 = shalt.err (!%p470_p5)
}
  0x2b   :  { %63 = dma.hbm_to_vmem [thread:$0]  %s603_s3, 256, %s58_s16, [#allocation9], %s504_s29, %s504_s29, %s505_s30  }
  0x2c   :  { %494 = dma.done.wait [#allocation3], 128  }
  0x2d   :  { %495 = vsyncadd [#allocation3], 4294967168 }
  0x2e   :  { %496 = dma.done.wait [#allocation6], 512  }
  0x2f   :  { %497 = vsyncadd [#allocation6], 4294966784 }
  0x30   :  { %498 = dma.done.wait [#allocation9], 256  }
  0x31   :  { %499 = vsyncadd [#allocation9], 4294967040  ;;  %v508_v0 = vmov 0.0   ;;  %vm509_vm0 = vmmov 0   ;;  %v387_v1 = vld [vmem:[#allocation5 + $0x8] sm:$0xff]   ;;  %v388_v2 = vld [vmem:[#allocation7 + $0x8] sm:$0xff]  }
  0x32   :  { %351 = vmatprep.subr.bf16.mxu0 %v508_v0  ;;  %359 = vmatprep.subr.bf16.mxu1 %v508_v0  ;;  %v389_v3 = vld [vmem:[#allocation5] sm:$0xff]   ;;  %v390_v4 = vld [vmem:[#allocation7] sm:$0xff]   ;;  %v391_v5 = vld [vmem:[#allocation2] sm:$0xff]   ;;  %vm113_vm1 = vcmask 261120   ;;  %s510_s23 = smov 32   ;;  %vm232_vm2 = vcmask 523520  }
  0x33   :  { %355 = vmatprep.mubr.msk.bf16.mxu0 %vm509_vm0, %v508_v0  ;;  %363 = vmatprep.mubr.msk.bf16.mxu1 %vm509_vm0, %v508_v0  ;;  %v392_v6 = vld [vmem:[#allocation8 + $0x8] sm:$0xff]   ;;  %v393_v7 = vld [vmem:[#allocation8] sm:$0xff]   ;;  %v329_v8 = vld [vmem:[%s604_s4] ss:$0 sm:$0xff]  ;;  %vm307_vm3 = vcmask 785920  }
  0x34   :  { %352 = vmatpush3.bf16.msra.mxu0 %v387_v1  ;;  %360 = vmatpush3.bf16.msra.mxu1 %v388_v2  ;;  %v334_v9 = vld [vmem:[%s605_s5] ss:$0 sm:$0xff]  ;;  %s511_s5 = smov [#allocation10]  }
  0x35   :  { %353 = vmatprep.subr.bf16.mxu0 %v508_v0  ;;  %361 = vmatprep.subr.bf16.mxu1 %v508_v0  ;;  %v338_v21 = vld [vmem:[%s606_s6] ss:$0 sm:$0xff]  ;;  %s315_s6 = sshll.u32 %s511_s5, 4  ;;  %s316_s6 = int_to_ptr.vmem [resolvable:$true] %s315_s6 }
  0x36   :  { %s474_s25 = scalar_lea.vmem %s316_s6, 256  ;;  %p479_p7 = scmp.lt.s32.totalorder %s316_s6, %s316_s6 }
  0x37   :  { %p475_p6 = scmp.ne.s32.totalorder %s316_s6, %s474_s25  ;;  %p480_p8 = scmp.lt.s32.totalorder %s474_s25, %s474_s25 }
  0x38   :  { %354 = vmatpush3.bf16.msra.mxu0 %v389_v3  ;;  %362 = vmatpush3.bf16.msra.mxu1 %v390_v4 }
  0x39   :  { %367 = vmatprep.subr.bf16.mxu0 %v508_v0  ;;  %p481_p9 = por %p480_p8, %p479_p7 }
  0x3b   :  { %356 = vmatmul.mubr.msk.bf16.vlgmr.msra.gmra.mxu0 %vm113_vm1, %v391_v5  ;;  %364 = vmatmul.mubr.msk.bf16.vlgmr.msra.gmra.mxu1 %vm113_vm1, %v391_v5  ;;  %p482_p10 = pnand %p481_p9, %p475_p6 }
  0x3c   :  { %368 = vmatpush3.bf16.msra.mxu0 %v392_v6  ;;  %371 = vmatprep.mubr.msk.bf16.mxu0 %vm509_vm0, %v508_v0 }
  0x3d   :  { %369 = vmatprep.subr.bf16.mxu0 %v508_v0 }
  0x40   :  { %370 = vmatpush3.bf16.msra.mxu0 %v393_v7 }
  0x43   :  { %372 = vmatmul.mubr.msk.bf16.vlgmr.msra.gmra.mxu0 %vm113_vm1, %v391_v5 }
  0xfb   :  { %v151_v10 = vpop.f32.mrf.mxu0  ;;  %v217_v12 = vpop.f32.mrf.mxu1 }
  0xfc   :  { %v152_v11 = vadd.f32 %v329_v8, %v151_v10  ;;  %v218_v14 = vadd.f32 %v334_v9, %v217_v12 }
  0xfd   :  { %v357_v13 = vpop.f32.mrf.mxu0  ;;  %v365_v15 = vpop.f32.mrf.mxu1 }
  0xfe   :  { %158 = vst.msk [vmem:[#allocation10] sm:$0xff] %vm113_vm1, %v152_v11  ;;  %226 = vrot.lane.b32.xlu0 %v218_v14, %s510_s23 }
  0xff   :  { %v154_v16 = vpop.f32.mrf.mxu0  ;;  %v220_v18 = vpop.f32.mrf.mxu1 }
 0x100   :  { %v155_v17 = vadd.f32 %v329_v8, %v154_v16  ;;  %v221_v20 = vadd.f32 %v334_v9, %v220_v18 }
 0x101   :  { %v358_v19 = vpop.f32.mrf.mxu0  ;;  %v366_v22 = vpop.f32.mrf.mxu1 }
 0x102   :  { %159 = vst.msk [vmem:[#allocation10 + $0x8] sm:$0xff] %vm113_vm1, %v155_v17  ;;  %228 = vrot.lane.b32.xlu0 %v221_v20, %s510_s23 }
 0x103   :  { %v292_v23 = vpop.f32.mrf.mxu0 }
 0x104   :  { %v293_v24 = vadd.f32 %v338_v21, %v292_v23 }
 0x105   :  { %v373_v25 = vpop.f32.mrf.mxu0 }
 0x106   :  { %301 = vrot.lane.b32.xlu1 %v293_v24, %s504_s29 }
 0x107   :  { %v295_v26 = vpop.f32.mrf.mxu0 }
 0x108   :  { %v296_v27 = vadd.f32 %v338_v21, %v295_v26 }
 0x109   :  { %v374_v28 = vpop.f32.mrf.mxu0 }
 0x10a   :  { %303 = vrot.lane.b32.xlu1 %v296_v27, %s504_s29 }
 0x170   :  { %v227_v29 = vpop.permute.xlu0 %226 }
 0x171   :  { %233 = vst.msk [vmem:[#allocation10] sm:$0xff] %vm232_vm2, %v227_v29 }
 0x174   :  { %v229_v30 = vpop.permute.xlu0 %228 }
 0x175   :  { %234 = vst.msk [vmem:[#allocation10 + $0x8] sm:$0xff] %vm232_vm2, %v229_v30 }
 0x178   :  { %v302_v31 = vpop.permute.xlu1 %301 }
 0x179   :  { %308 = vst.msk [vmem:[#allocation10] sm:$0xff] %vm307_vm3, %v302_v31 }
 0x17c   :  { %v304_v32 = vpop.permute.xlu1 %303 }
 0x17d   :  { %309 = vst.msk [vmem:[#allocation10 + $0x8] sm:$0xff] %vm307_vm3, %v304_v32 }
 0x17e   :  { %485 = shalt.err (!%p482_p10)
}
 0x17f   :  { %s512_s26 = smov 128   ;;  %s513_s27 = smov 8  }
 0x180   :  { %321 = dma.vmem_to_hbm [thread:$0]  %s316_s6, 256, %s607_s7, [#allocation4], %s512_s26, %s512_s26, %s513_s27  }
 0x181   :  { %500 = dma.done.wait [#allocation4], 256  }
 0x182   :  { %501 = vsyncadd [#allocation4], 4294967040 }
 0x183   :  { %325 = vsyncpa [#allocation3], 1 }
 0x184   :  { %326 = vsyncpa [#allocation6], 1 }
 0x185   :  { %327 = vsyncpa [#allocation9], 1 }
 0x186   :  { %328 = vsyncpa [#allocation4], 1 }

// kernel: tpu_custom_call.1
= control target key start
LH: loop header
LB: loop body
LE: loop exit
PB: predicated region body
PF: predicated region fallthrough
CT: control target
= control target key end

     0   :  { %12 = vsyncpa [#allocation3], 0  ;;  %s600_s0 = inlined_call_operand.hbm [shape: bf16[16,32], index: 0, kind: input, shape index: {}]   ;;  %s601_s1 = inlined_call_operand.hbm [shape: bf16[32,32], index: 1, kind: input, shape index: {}]   ;;  %s602_s2 = inlined_call_operand.hbm [shape: bf16[32,32], index: 2, kind: input, shape index: {}]   ;;  %s603_s3 = inlined_call_operand.hbm [shape: bf16[32,32], index: 3, kind: input, shape index: {}]   ;;  %s604_s4 = inlined_call_operand.vmem [shape: f32[1,32], index: 4, kind: input, shape index: {}]   ;;  %s605_s5 = inlined_call_operand.vmem [shape: f32[1,32], index: 5, kind: input, shape index: {}]   ;;  %s606_s6 = inlined_call_operand.vmem [shape: f32[1,32], index: 6, kind: input, shape index: {}]   ;;  %s607_s7 = inlined_call_operand.hbm [shape: f32[16,96], index: 7, kind: output, shape index: {}]  }
   0x1   :  { %13 = vsyncpa [#allocation6], 0 }
   0x2   :  { %14 = vsyncpa [#allocation9], 0 }
   0x3   :  { %15 = vsyncpa [#allocation4], 0  ;;  %s502_s24 = smov [#allocation5]   ;;  %s503_s26 = smov [#allocation2]  }
   0x4   :  { %s33_s25 = sshll.u32 %s502_s24, 4  ;;  %s21_s27 = sshll.u32 %s503_s26, 4  ;;  %s34_s25 = int_to_ptr.vmem [resolvable:$true] %s33_s25  ;;  %s22_s27 = int_to_ptr.vmem [resolvable:$true] %s21_s27 }
   0x5   :  { %s402_s28 = scalar_lea.vmem %s34_s25, 256  ;;  %p407_p1 = scmp.lt.s32.totalorder %s34_s25, %s34_s25 }
   0x6   :  { %p403_p0 = scmp.ne.s32.totalorder %s34_s25, %s402_s28  ;;  %p408_p2 = scmp.lt.s32.totalorder %s402_s28, %s402_s28 }
   0x8   :  { %p409_p3 = por %p408_p2, %p407_p1 }
   0xa   :  { %p410_p4 = pnand %p409_p3, %p403_p0 }
   0xc   :  { %413 = shalt.err (!%p410_p4)
}
   0xd   :  { %s504_s29 = smov 64   ;;  %s505_s30 = smov 4  }
   0xe   :  { %39 = dma.hbm_to_vmem [thread:$0]  %s601_s1, 256, %s34_s25, [#allocation6], %s504_s29, %s504_s29, %s505_s30  }
   0xf   :  { %s422_s10 = scalar_lea.vmem %s22_s27, 128  ;;  %p427_p6 = scmp.lt.s32.totalorder %s22_s27, %s22_s27 }
  0x10   :  { %p423_p5 = scmp.ne.s32.totalorder %s22_s27, %s422_s10  ;;  %p428_p7 = scmp.lt.s32.totalorder %s422_s10, %s422_s10 }
  0x12   :  { %p429_p8 = por %p428_p7, %p427_p6 }
  0x14   :  { %p430_p9 = pnand %p429_p8, %p423_p5 }
  0x16   :  { %433 = shalt.err (!%p430_p9)
}
  0x17   :  { %27 = dma.hbm_to_vmem [thread:$0]  %s600_s0, 128, %s22_s27, [#allocation3], %s504_s29, %s504_s29, %s505_s30  }
  0x18   :  { %s506_s13 = smov [#allocation7]   ;;  %s507_s15 = smov [#allocation8]  }
  0x19   :  { %s45_s14 = sshll.u32 %s506_s13, 4  ;;  %s57_s16 = sshll.u32 %s507_s15, 4  ;;  %s46_s14 = int_to_ptr.vmem [resolvable:$true] %s45_s14  ;;  %s58_s16 = int_to_ptr.vmem [resolvable:$true] %s57_s16 }
  0x1a   :  { %s442_s1 = scalar_lea.vmem %s46_s14, 256  ;;  %p447_p11 = scmp.lt.s32.totalorder %s46_s14, %s46_s14 }
  0x1b   :  { %p443_p10 = scmp.ne.s32.totalorder %s46_s14, %s442_s1  ;;  %p448_p12 = scmp.lt.s32.totalorder %s442_s1, %s442_s1 }
  0x1d   :  { %p449_p13 = por %p448_p12, %p447_p11 }
  0x1f   :  { %p450_p0 = pnand %p449_p13, %p443_p10 }
  0x21   :  { %453 = shalt.err (!%p450_p0)
}
  0x22   :  { %51 = dma.hbm_to_vmem [thread:$0]  %s602_s2, 256, %s46_s14, [#allocation6], %s504_s29, %s504_s29, %s505_s30  }
  0x23   :  { %s462_s0 = scalar_lea.vmem %s58_s16, 256  ;;  %p467_p2 = scmp.lt.s32.totalorder %s58_s16, %s58_s16 }
  0x24   :  { %p463_p1 = scmp.ne.s32.totalorder %s58_s16, %s462_s0  ;;  %p468_p3 = scmp.lt.s32.totalorder %s462_s0, %s462_s0 }
  0x26   :  { %p469_p4 = por %p468_p3, %p467_p2 }
  0x28   :  { %p470_p5 = pnand %p469_p4, %p463_p1 }
  0x2a   :  { %473 = shalt.err (!%p470_p5)
}
  0x2b   :  { %63 = dma.hbm_to_vmem [thread:$0]  %s603_s3, 256, %s58_s16, [#allocation9], %s504_s29, %s504_s29, %s505_s30  }
  0x2c   :  { %494 = dma.done.wait [#allocation3], 128  }
  0x2d   :  { %495 = vsyncadd [#allocation3], 4294967168 }
  0x2e   :  { %496 = dma.done.wait [#allocation6], 512  }
  0x2f   :  { %497 = vsyncadd [#allocation6], 4294966784 }
  0x30   :  { %498 = dma.done.wait [#allocation9], 256  }
  0x31   :  { %499 = vsyncadd [#allocation9], 4294967040  ;;  %v508_v0 = vmov 0.0   ;;  %vm509_vm0 = vmmov 0   ;;  %v387_v1 = vld [vmem:[#allocation5 + $0x8] sm:$0xff]   ;;  %v388_v2 = vld [vmem:[#allocation7 + $0x8] sm:$0xff]  }
  0x32   :  { %351 = vmatprep.subr.bf16.mxu0 %v508_v0  ;;  %359 = vmatprep.subr.bf16.mxu1 %v508_v0  ;;  %v389_v3 = vld [vmem:[#allocation5] sm:$0xff]   ;;  %v390_v4 = vld [vmem:[#allocation7] sm:$0xff]   ;;  %v391_v5 = vld [vmem:[#allocation2] sm:$0xff]   ;;  %vm113_vm1 = vcmask 261120   ;;  %s510_s23 = smov 32   ;;  %vm232_vm2 = vcmask 523520  }
  0x33   :  { %355 = vmatprep.mubr.msk.bf16.mxu0 %vm509_vm0, %v508_v0  ;;  %363 = vmatprep.mubr.msk.bf16.mxu1 %vm509_vm0, %v508_v0  ;;  %v392_v6 = vld [vmem:[#allocation8 + $0x8] sm:$0xff]   ;;  %v393_v7 = vld [vmem:[#allocation8] sm:$0xff]   ;;  %v329_v8 = vld [vmem:[%s604_s4] ss:$0 sm:$0xff]  ;;  %vm307_vm3 = vcmask 785920  }
  0x34   :  { %352 = vmatpush3.bf16.msra.mxu0 %v387_v1  ;;  %360 = vmatpush3.bf16.msra.mxu1 %v388_v2  ;;  %v334_v9 = vld [vmem:[%s605_s5] ss:$0 sm:$0xff]  ;;  %s511_s5 = smov [#allocation10]  }
  0x35   :  { %353 = vmatprep.subr.bf16.mxu0 %v508_v0  ;;  %361 = vmatprep.subr.bf16.mxu1 %v508_v0  ;;  %v338_v21 = vld [vmem:[%s606_s6] ss:$0 sm:$0xff]  ;;  %s315_s6 = sshll.u32 %s511_s5, 4  ;;  %s316_s6 = int_to_ptr.vmem [resolvable:$true] %s315_s6 }
  0x36   :  { %s474_s25 = scalar_lea.vmem %s316_s6, 256  ;;  %p479_p7 = scmp.lt.s32.totalorder %s316_s6, %s316_s6 }
  0x37   :  { %p475_p6 = scmp.ne.s32.totalorder %s316_s6, %s474_s25  ;;  %p480_p8 = scmp.lt.s32.totalorder %s474_s25, %s474_s25 }
  0x38   :  { %354 = vmatpush3.bf16.msra.mxu0 %v389_v3  ;;  %362 = vmatpush3.bf16.msra.mxu1 %v390_v4 }
  0x39   :  { %367 = vmatprep.subr.bf16.mxu0 %v508_v0  ;;  %p481_p9 = por %p480_p8, %p479_p7 }
  0x3b   :  { %356 = vmatmul.mubr.msk.bf16.vlgmr.msra.gmra.mxu0 %vm113_vm1, %v391_v5  ;;  %364 = vmatmul.mubr.msk.bf16.vlgmr.msra.gmra.mxu1 %vm113_vm1, %v391_v5  ;;  %p482_p10 = pnand %p481_p9, %p475_p6 }
  0x3c   :  { %368 = vmatpush3.bf16.msra.mxu0 %v392_v6  ;;  %371 = vmatprep.mubr.msk.bf16.mxu0 %vm509_vm0, %v508_v0 }
  0x3d   :  { %369 = vmatprep.subr.bf16.mxu0 %v508_v0 }
  0x40   :  { %370 = vmatpush3.bf16.msra.mxu0 %v393_v7 }
  0x43   :  { %372 = vmatmul.mubr.msk.bf16.vlgmr.msra.gmra.mxu0 %vm113_vm1, %v391_v5 }
  0xfb   :  { %v151_v10 = vpop.f32.mrf.mxu0  ;;  %v217_v12 = vpop.f32.mrf.mxu1 }
  0xfc   :  { %v152_v11 = vadd.f32 %v329_v8, %v151_v10  ;;  %v218_v14 = vadd.f32 %v334_v9, %v217_v12 }
  0xfd   :  { %v357_v13 = vpop.f32.mrf.mxu0  ;;  %v365_v15 = vpop.f32.mrf.mxu1 }
  0xfe   :  { %158 = vst.msk [vmem:[#allocation10] sm:$0xff] %vm113_vm1, %v152_v11  ;;  %226 = vrot.lane.b32.xlu0 %v218_v14, %s510_s23 }
  0xff   :  { %v154_v16 = vpop.f32.mrf.mxu0  ;;  %v220_v18 = vpop.f32.mrf.mxu1 }
 0x100   :  { %v155_v17 = vadd.f32 %v329_v8, %v154_v16  ;;  %v221_v20 = vadd.f32 %v334_v9, %v220_v18 }
 0x101   :  { %v358_v19 = vpop.f32.mrf.mxu0  ;;  %v366_v22 = vpop.f32.mrf.mxu1 }
 0x102   :  { %159 = vst.msk [vmem:[#allocation10 + $0x8] sm:$0xff] %vm113_vm1, %v155_v17  ;;  %228 = vrot.lane.b32.xlu0 %v221_v20, %s510_s23 }
 0x103   :  { %v292_v23 = vpop.f32.mrf.mxu0 }
 0x104   :  { %v293_v24 = vadd.f32 %v338_v21, %v292_v23 }
 0x105   :  { %v373_v25 = vpop.f32.mrf.mxu0 }
 0x106   :  { %301 = vrot.lane.b32.xlu1 %v293_v24, %s504_s29 }
 0x107   :  { %v295_v26 = vpop.f32.mrf.mxu0 }
 0x108   :  { %v296_v27 = vadd.f32 %v338_v21, %v295_v26 }
 0x109   :  { %v374_v28 = vpop.f32.mrf.mxu0 }
 0x10a   :  { %303 = vrot.lane.b32.xlu1 %v296_v27, %s504_s29 }
 0x170   :  { %v227_v29 = vpop.permute.xlu0 %226 }
 0x171   :  { %233 = vst.msk [vmem:[#allocation10] sm:$0xff] %vm232_vm2, %v227_v29 }
 0x174   :  { %v229_v30 = vpop.permute.xlu0 %228 }
 0x175   :  { %234 = vst.msk [vmem:[#allocation10 + $0x8] sm:$0xff] %vm232_vm2, %v229_v30 }
 0x178   :  { %v302_v31 = vpop.permute.xlu1 %301 }
 0x179   :  { %308 = vst.msk [vmem:[#allocation10] sm:$0xff] %vm307_vm3, %v302_v31 }
 0x17c   :  { %v304_v32 = vpop.permute.xlu1 %303 }
 0x17d   :  { %309 = vst.msk [vmem:[#allocation10 + $0x8] sm:$0xff] %vm307_vm3, %v304_v32 }
 0x17e   :  { %485 = shalt.err (!%p482_p10)
}
 0x17f   :  { %s512_s26 = smov 128   ;;  %s513_s27 = smov 8  }
 0x180   :  { %321 = dma.vmem_to_hbm [thread:$0]  %s316_s6, 256, %s607_s7, [#allocation4], %s512_s26, %s512_s26, %s513_s27  }
 0x181   :  { %500 = dma.done.wait [#allocation4], 256  }
 0x182   :  { %501 = vsyncadd [#allocation4], 4294967040 }
 0x183   :  { %325 = vsyncpa [#allocation3], 1 }
 0x184   :  { %326 = vsyncpa [#allocation6], 1 }
 0x185   :  { %327 = vsyncpa [#allocation9], 1 }
 0x186   :  { %328 = vsyncpa [#allocation4], 1 }

</bundles_post_ra>
